<compile_context>
chip_gen: v6e
topology: v6e:2x2x1
jax: 0.10.0
libtpu: 0.0.40
codegen_flags: <defaults>
</compile_context>

<pallas_src>
import jax
import jax.numpy as jnp
from jax.experimental import pallas as pl
from jax.experimental.pallas import tpu as pltpu


def _shortcut_kernel(ph_ref, pwt_ref, a_ref, b_ref, w_ref, cb_ref,
                     x_ref, y_ref, out_ref, p_scr, zf_scr):
    """One block of B batch elements per grid step.

    ph_ref  : (Hy, Hx)   f32   height pooling matrix
    pwt_ref : (Wx, Wy)   bf16  width pooling matrix, transposed
    a_ref   : (C, 1)     f32   folded BN scale
    b_ref   : (C, 1)     f32   folded BN shift
    w_ref   : (Co, C)    bf16  1x1 conv weight
    cb_ref  : (Co, 1)    f32   conv bias
    x_ref   : (B, C, Hx, Wx)   bf16  input block (NCHW)
    y_ref   : (B, Co, S_out)   bf16  residual block (spatial flattened)
    out_ref : (B, Co, S_out)   f32
    p_scr   : (B, C, Hy, Wy)   f32   VMEM scratch (pooled)
    zf_scr  : (B, C, S_out)    bf16  VMEM scratch (relu'd, lane-flattened)
    """
    B, C, Hx, Wx = x_ref.shape
    _, Co, S_out = out_ref.shape
    Hy = ph_ref.shape[0]
    Wy = pwt_ref.shape[1]

    # ---- adaptive average pool, factorized: width then height (MXU, f32 acc) ----
    x2 = x_ref[...].reshape(B * C * Hx, Wx)                 # leading-dim merge only
    t1 = jnp.dot(x2, pwt_ref[...],
                 preferred_element_type=jnp.float32)        # (B*C*Hx, Wy)
    t1 = t1.reshape(B * C, Hx, Wy)
    ph_b = jnp.broadcast_to(ph_ref[...], (B * C, Hy, Hx))
    pooled = jax.lax.dot_general(
        ph_b, t1, (((2,), (1,)), ((0,), (0,))),
        preferred_element_type=jnp.float32)                 # (B*C, Hy, Wy)
    p_scr[...] = pooled.reshape(B, C, Hy, Wy)

    # ---- BN affine + ReLU, fused with the (Hy, Wy) -> S_out lane flatten ----
    a = a_ref[...]                                          # (C, 1)
    b = b_ref[...]
    for u in range(Hy):                                     # static unroll, Hy small
        row = p_scr[:, :, u, :]                             # (B, C, Wy) f32
        zrow = jnp.maximum(row * a + b, 0.0)
        zf_scr[:, :, u * Wy:(u + 1) * Wy] = zrow.astype(zf_scr.dtype)

    # ---- 1x1 conv as a batched MXU matmul + bias + residual add ----
    zf = zf_scr[...]                                        # (B, C, S_out) bf16
    w_b = jnp.broadcast_to(w_ref[...], (B, Co, C))          # bf16
    conv = jax.lax.dot_general(
        w_b, zf, (((2,), (1,)), ((0,), (0,))),
        preferred_element_type=jnp.float32)                 # (B, Co, S_out)
    out_ref[...] = conv + cb_ref[...] + y_ref[...].astype(jnp.float32)


def _adaptive_pool_matrix(in_size, out_size):
    """(out_size, in_size) averaging matrix matching F.adaptive_avg_pool2d."""
    i = jnp.arange(out_size)
    start = (i * in_size) // out_size                        # floor(i*in/out)
    end = ((i + 1) * in_size + out_size - 1) // out_size     # ceil((i+1)*in/out)
    j = jnp.arange(in_size)
    mask = (j[None, :] >= start[:, None]) & (j[None, :] < end[:, None])
    counts = (end - start).astype(jnp.float32)
    return mask.astype(jnp.float32) / counts[:, None]


def _pick_batch_block(n, per_batch_bytes, max_block=8, vmem_budget=12 << 20):
    """Largest divisor of n that fits the VMEM budget; prefer grid length >= 2."""
    divisors = [d for d in range(1, min(n, max_block) + 1)
                if n % d == 0 and d * per_batch_bytes <= vmem_budget]
    if not divisors:
        return 1
    multi_step = [d for d in divisors if n // d >= 2]
    return max(multi_step) if multi_step else max(divisors)


def shortcut_c_forward(x_nchw, y_nchw, params, eps=1e-5):
    N, C, Hx, Wx = x_nchw.shape
    Ny, Co, Hy, Wy = y_nchw.shape
    assert N == Ny
    s_out = Hy * Wy

    # factorized pooling matrices (tiny)
    ph = _adaptive_pool_matrix(Hx, Hy).astype(jnp.float32)          # (Hy, Hx)
    pwt = _adaptive_pool_matrix(Wx, Wy).T.astype(jnp.bfloat16)      # (Wx, Wy)

    # folded BN affine (inference mode)
    a = params["gamma"] / jnp.sqrt(params["var"] + eps)
    b = params["beta"] - params["mean"] * a
    a = a.astype(jnp.float32).reshape(C, 1)
    b = b.astype(jnp.float32).reshape(C, 1)

    w2 = params["w"][:, :, 0, 0].astype(jnp.bfloat16)               # (Co, C)
    cb = params["cb"].astype(jnp.float32).reshape(Co, 1)

    # streamed tensors: bf16 casts only; reshapes are contiguous (no HBM pass)
    x4 = x_nchw.astype(jnp.bfloat16)                                # (N, C, Hx, Wx)
    y3 = y_nchw.astype(jnp.bfloat16).reshape(N, Co, s_out)          # (N, Co, S_out)

    # VMEM-aware batch block (double-buffered streamed blocks + scratch)
    per_batch_bytes = (2 * (C * Hx * Wx * 2 + Co * s_out * 2 + Co * s_out * 4)
                       + C * s_out * 6)
    B = _pick_batch_block(N, per_batch_bytes)
    grid = (N // B,)

    out3 = pl.pallas_call(
        _shortcut_kernel,
        out_shape=jax.ShapeDtypeStruct((N, Co, s_out), jnp.float32),
        grid=grid,
        in_specs=[
            pl.BlockSpec((Hy, Hx), lambda n: (0, 0)),               # P_h
            pl.BlockSpec((Wx, Wy), lambda n: (0, 0)),               # P_w^T
            pl.BlockSpec((C, 1), lambda n: (0, 0)),                 # bn scale
            pl.BlockSpec((C, 1), lambda n: (0, 0)),                 # bn shift
            pl.BlockSpec((Co, C), lambda n: (0, 0)),                # conv weight
            pl.BlockSpec((Co, 1), lambda n: (0, 0)),                # conv bias
            pl.BlockSpec((B, C, Hx, Wx), lambda n: (n, 0, 0, 0)),   # x block
            pl.BlockSpec((B, Co, s_out), lambda n: (n, 0, 0)),      # y block
        ],
        out_specs=pl.BlockSpec((B, Co, s_out), lambda n: (n, 0, 0)),
        scratch_shapes=[
            pltpu.VMEM((B, C, Hy, Wy), jnp.float32),
            pltpu.VMEM((B, C, s_out), jnp.bfloat16),
        ],
        compiler_params=pltpu.CompilerParams(dimension_semantics=("parallel",)),
    )(ph, pwt, a, b, w2, cb, x4, y3)

    return out3.reshape(N, Co, Hy, Wy)                              # free reshape


# ------------------- plain-JAX reference (true f32 semantics) -------------------
def _reference_forward(x, y, p, eps=1e-5):
    N, C, Hx, Wx = x.shape
    _, Co, Hy, Wy = y.shape
    rows = []
    for u in range(Hy):                                     # PyTorch floor/ceil windows
        h0 = (u * Hx) // Hy
        h1 = -((-(u + 1) * Hx) // Hy)
        cols = []
        for v in range(Wy):
            w0 = (v * Wx) // Wy
            w1 = -((-(v + 1) * Wx) // Wy)
            cols.append(jnp.mean(x[:, :, h0:h1, w0:w1], axis=(2, 3)))
        rows.append(jnp.stack(cols, axis=-1))
    xp = jnp.stack(rows, axis=-2)                           # (N, C, Hy, Wy)
    a = p["gamma"] / jnp.sqrt(p["var"] + eps)
    b = p["beta"] - p["mean"] * a
    z = jnp.maximum(xp * a[None, :, None, None] + b[None, :, None, None], 0.0)
    conv = jnp.einsum("nchw,oc->nohw", z, p["w"][:, :, 0, 0])
    return conv + p["cb"][None, :, None, None] + y


if __name__ == "__main__":
    def _run_case(key, n, cin, cout, hx, wx, hy, wy):
        ks = jax.random.split(key, 8)
        params = {
            "gamma": jax.random.uniform(ks[0], (cin,), jnp.float32, 0.5, 1.5),
            "beta": 0.1 * jax.random.normal(ks[1], (cin,), jnp.float32),
            "mean": 0.1 * jax.random.normal(ks[2], (cin,), jnp.float32),
            "var": jax.random.uniform(ks[3], (cin,), jnp.float32, 0.5, 1.5),
            "w": 0.2 * jax.random.normal(ks[4], (cout, cin, 1, 1), jnp.float32),
            "cb": 0.1 * jax.random.normal(ks[5], (cout,), jnp.float32),
        }
        x = jax.random.normal(ks[6], (n, cin, hx, wx), jnp.float32)
        y = jax.random.normal(ks[7], (n, cout, hy, wy), jnp.float32)
        out = jax.block_until_ready(shortcut_c_forward(x, y, params))
        ref = _reference_forward(x, y, params)
        assert out.shape == (n, cout, hy, wy), out.shape
        err = float(jnp.max(jnp.abs(out - ref)))
        # bf16-streamed x / y / w contribute ~4e-3 relative rounding each;
        # 4e-2 absolute is a comfortable budget for O(1)-magnitude outputs.
        assert err < 4e-2, f"mismatch vs reference: {err}"

    root = jax.random.PRNGKey(0)
    k1, k2 = jax.random.split(root)
    # stride-2-style shortcut (divisible pooling): B=1 per step, grid=(2,)
    _run_case(k1, 2, 4, 8, 16, 16, 8, 8)
    # general floor/ceil adaptive-pool windows (24 -> 9): B=2 per step, grid=(2,)
    _run_case(k2, 4, 4, 8, 24, 24, 9, 9)
    print("KERNEL_OK")
</pallas_src>

<mosaic_0001>
module attributes {stable_mosaic.version = 11 : i64} {
  func.func @_shortcut_kernel(%arg0: i32, %arg1: memref<8x16xf32, #tpu.memory_space<vmem>>, %arg2: memref<16x8xbf16, #tpu.memory_space<vmem>>, %arg3: memref<4x1xf32, #tpu.memory_space<vmem>>, %arg4: memref<4x1xf32, #tpu.memory_space<vmem>>, %arg5: memref<8x4xbf16, #tpu.memory_space<vmem>>, %arg6: memref<8x1xf32, #tpu.memory_space<vmem>>, %arg7: memref<1x4x16x16xbf16, #tpu.memory_space<vmem>>, %arg8: memref<1x8x64xbf16, #tpu.memory_space<vmem>>, %arg9: memref<1x8x64xf32, #tpu.memory_space<vmem>>, %arg10: memref<1x4x8x8xf32, #tpu.memory_space<vmem>>, %arg11: memref<1x4x64xbf16, #tpu.memory_space<vmem>>) attributes {dimension_semantics = [#tpu.dimension_semantics<parallel>], iteration_bounds = array<i64: 2>, scalar_prefetch = 0 : i64, scratch_operands = 2 : i64, tpu.core_type = #tpu.core_type<tc>, window_params = [{pipeline_mode = #tpu.pipeline_mode<synchronous>, transform_indices = @transform_0, window_bounds = array<i64: 8, 16>}, {pipeline_mode = #tpu.pipeline_mode<synchronous>, transform_indices = @transform_1, window_bounds = array<i64: 16, 8>}, {pipeline_mode = #tpu.pipeline_mode<synchronous>, transform_indices = @transform_2, window_bounds = array<i64: 4, 1>}, {pipeline_mode = #tpu.pipeline_mode<synchronous>, transform_indices = @transform_3, window_bounds = array<i64: 4, 1>}, {pipeline_mode = #tpu.pipeline_mode<synchronous>, transform_indices = @transform_4, window_bounds = array<i64: 8, 4>}, {pipeline_mode = #tpu.pipeline_mode<synchronous>, transform_indices = @transform_5, window_bounds = array<i64: 8, 1>}, {transform_indices = @transform_6, window_bounds = array<i64: 1, 4, 16, 16>}, {transform_indices = @transform_7, window_bounds = array<i64: 1, 8, 64>}, {transform_indices = @transform_8, window_bounds = array<i64: 1, 8, 64>}]} {
    %c0 = arith.constant 0 : index
    %c0_0 = arith.constant 0 : index
    %c0_1 = arith.constant 0 : index
    %c0_2 = arith.constant 0 : index
    %0 = vector.load %arg7[%c0, %c0_0, %c0_1, %c0_2] : memref<1x4x16x16xbf16, #tpu.memory_space<vmem>>, vector<1x4x16x16xbf16>
    %1 = vector.shape_cast %0 : vector<1x4x16x16xbf16> to vector<64x16xbf16>
    %c0_3 = arith.constant 0 : index
    %c0_4 = arith.constant 0 : index
    %2 = vector.load %arg2[%c0_3, %c0_4] : memref<16x8xbf16, #tpu.memory_space<vmem>>, vector<16x8xbf16>
    %cst = arith.constant dense<0.000000e+00> : vector<64x8xf32>
    %3 = tpu.matmul %1, %2, %cst {dimension_numbers = #tpu.dot_dimension_numbers<[1], [0], [0], [1], [0, 0, 1, 1], [], []>} : vector<64x16xbf16>, vector<16x8xbf16>, vector<64x8xf32> -> vector<64x8xf32>
    %4 = vector.shape_cast %3 : vector<64x8xf32> to vector<4x16x8xf32>
    %c0_5 = arith.constant 0 : index
    %c0_6 = arith.constant 0 : index
    %5 = vector.load %arg1[%c0_5, %c0_6] : memref<8x16xf32, #tpu.memory_space<vmem>>, vector<8x16xf32>
    %6 = vector.shape_cast %5 : vector<8x16xf32> to vector<1x8x16xf32>
    %7 = vector.broadcast %6 : vector<1x8x16xf32> to vector<4x8x16xf32>
    %cst_7 = arith.constant dense<0.000000e+00> : vector<4x8x8xf32>
    %8 = tpu.matmul %7, %4, %cst_7 {dimension_numbers = #tpu.dot_dimension_numbers<[2], [1], [1], [2], [0, 0, 0, 1, 1, 2], [0], [0]>} : vector<4x8x16xf32>, vector<4x16x8xf32>, vector<4x8x8xf32> -> vector<4x8x8xf32>
    %9 = vector.shape_cast %8 : vector<4x8x8xf32> to vector<1x4x8x8xf32>
    %c0_8 = arith.constant 0 : index
    %c0_9 = arith.constant 0 : index
    %c0_10 = arith.constant 0 : index
    %c0_11 = arith.constant 0 : index
    %10 = vector.load %arg10[%c0_8, %c0_9, %c0_10, %c0_11] : memref<1x4x8x8xf32, #tpu.memory_space<vmem>>, vector<1x4x8x8xf32>
    tpu.vector_store %arg10[%c0_8, %c0_9, %c0_10, %c0_11], %9 {strides = array<i32>} : memref<1x4x8x8xf32, #tpu.memory_space<vmem>>, vector<1x4x8x8xf32>,
    %c0_12 = arith.constant 0 : index
    %c0_13 = arith.constant 0 : index
    %11 = vector.load %arg3[%c0_12, %c0_13] : memref<4x1xf32, #tpu.memory_space<vmem>>, vector<4x1xf32>
    %c0_14 = arith.constant 0 : index
    %c0_15 = arith.constant 0 : index
    %12 = vector.load %arg4[%c0_14, %c0_15] : memref<4x1xf32, #tpu.memory_space<vmem>>, vector<4x1xf32>
    %c0_16 = arith.constant 0 : index
    %c0_17 = arith.constant 0 : index
    %c0_18 = arith.constant 0 : index
    %c0_19 = arith.constant 0 : index
    %13 = vector.load %arg10[%c0_16, %c0_17, %c0_18, %c0_19] : memref<1x4x8x8xf32, #tpu.memory_space<vmem>>, vector<1x4x1x8xf32>
    %14 = vector.shape_cast %13 : vector<1x4x1x8xf32> to vector<1x4x8xf32>
    %15 = vector.shape_cast %11 : vector<4x1xf32> to vector<1x4x1xf32>
    %16 = vector.broadcast %15 : vector<1x4x1xf32> to vector<1x4x8xf32>
    %17 = arith.mulf %14, %16 : vector<1x4x8xf32>
    %18 = vector.shape_cast %12 : vector<4x1xf32> to vector<1x4x1xf32>
    %19 = vector.broadcast %18 : vector<1x4x1xf32> to vector<1x4x8xf32>
    %20 = arith.addf %17, %19 : vector<1x4x8xf32>
    %cst_20 = arith.constant 0.000000e+00 : f32
    %21 = vector.broadcast %cst_20 : f32 to vector<1x4x8xf32>
    %22 = arith.maximumf %20, %21 : vector<1x4x8xf32>
    %23 = arith.truncf %22 : vector<1x4x8xf32> to vector<1x4x8xbf16>
    %c0_21 = arith.constant 0 : index
    %c0_22 = arith.constant 0 : index
    %c0_23 = arith.constant 0 : index
    %24 = vector.load %arg11[%c0_21, %c0_22, %c0_23] : memref<1x4x64xbf16, #tpu.memory_space<vmem>>, vector<1x4x8xbf16>
    tpu.vector_store %arg11[%c0_21, %c0_22, %c0_23], %23 {strides = array<i32>} : memref<1x4x64xbf16, #tpu.memory_space<vmem>>, vector<1x4x8xbf16>,
    %c0_24 = arith.constant 0 : index
    %c0_25 = arith.constant 0 : index
    %c1 = arith.constant 1 : index
    %c0_26 = arith.constant 0 : index
    %25 = vector.load %arg10[%c0_24, %c0_25, %c1, %c0_26] : memref<1x4x8x8xf32, #tpu.memory_space<vmem>>, vector<1x4x1x8xf32>
    %26 = vector.shape_cast %25 : vector<1x4x1x8xf32> to vector<1x4x8xf32>
    %27 = vector.shape_cast %11 : vector<4x1xf32> to vector<1x4x1xf32>
    %28 = vector.broadcast %27 : vector<1x4x1xf32> to vector<1x4x8xf32>
    %29 = arith.mulf %26, %28 : vector<1x4x8xf32>
    %30 = vector.shape_cast %12 : vector<4x1xf32> to vector<1x4x1xf32>
    %31 = vector.broadcast %30 : vector<1x4x1xf32> to vector<1x4x8xf32>
    %32 = arith.addf %29, %31 : vector<1x4x8xf32>
    %cst_27 = arith.constant 0.000000e+00 : f32
    %33 = vector.broadcast %cst_27 : f32 to vector<1x4x8xf32>
    %34 = arith.maximumf %32, %33 : vector<1x4x8xf32>
    %35 = arith.truncf %34 : vector<1x4x8xf32> to vector<1x4x8xbf16>
    %c0_28 = arith.constant 0 : index
    %c0_29 = arith.constant 0 : index
    %c8 = arith.constant 8 : index
    %36 = vector.load %arg11[%c0_28, %c0_29, %c8] : memref<1x4x64xbf16, #tpu.memory_space<vmem>>, vector<1x4x8xbf16>
    tpu.vector_store %arg11[%c0_28, %c0_29, %c8], %35 {strides = array<i32>} : memref<1x4x64xbf16, #tpu.memory_space<vmem>>, vector<1x4x8xbf16>,
    %c0_30 = arith.constant 0 : index
    %c0_31 = arith.constant 0 : index
    %c2 = arith.constant 2 : index
    %c0_32 = arith.constant 0 : index
    %37 = vector.load %arg10[%c0_30, %c0_31, %c2, %c0_32] : memref<1x4x8x8xf32, #tpu.memory_space<vmem>>, vector<1x4x1x8xf32>
    %38 = vector.shape_cast %37 : vector<1x4x1x8xf32> to vector<1x4x8xf32>
    %39 = vector.shape_cast %11 : vector<4x1xf32> to vector<1x4x1xf32>
    %40 = vector.broadcast %39 : vector<1x4x1xf32> to vector<1x4x8xf32>
    %41 = arith.mulf %38, %40 : vector<1x4x8xf32>
    %42 = vector.shape_cast %12 : vector<4x1xf32> to vector<1x4x1xf32>
    %43 = vector.broadcast %42 : vector<1x4x1xf32> to vector<1x4x8xf32>
    %44 = arith.addf %41, %43 : vector<1x4x8xf32>
    %cst_33 = arith.constant 0.000000e+00 : f32
    %45 = vector.broadcast %cst_33 : f32 to vector<1x4x8xf32>
    %46 = arith.maximumf %44, %45 : vector<1x4x8xf32>
    %47 = arith.truncf %46 : vector<1x4x8xf32> to vector<1x4x8xbf16>
    %c0_34 = arith.constant 0 : index
    %c0_35 = arith.constant 0 : index
    %c16 = arith.constant 16 : index
    %48 = vector.load %arg11[%c0_34, %c0_35, %c16] : memref<1x4x64xbf16, #tpu.memory_space<vmem>>, vector<1x4x8xbf16>
    tpu.vector_store %arg11[%c0_34, %c0_35, %c16], %47 {strides = array<i32>} : memref<1x4x64xbf16, #tpu.memory_space<vmem>>, vector<1x4x8xbf16>,
    %c0_36 = arith.constant 0 : index
    %c0_37 = arith.constant 0 : index
    %c3 = arith.constant 3 : index
    %c0_38 = arith.constant 0 : index
    %49 = vector.load %arg10[%c0_36, %c0_37, %c3, %c0_38] : memref<1x4x8x8xf32, #tpu.memory_space<vmem>>, vector<1x4x1x8xf32>
    %50 = vector.shape_cast %49 : vector<1x4x1x8xf32> to vector<1x4x8xf32>
    %51 = vector.shape_cast %11 : vector<4x1xf32> to vector<1x4x1xf32>
    %52 = vector.broadcast %51 : vector<1x4x1xf32> to vector<1x4x8xf32>
    %53 = arith.mulf %50, %52 : vector<1x4x8xf32>
    %54 = vector.shape_cast %12 : vector<4x1xf32> to vector<1x4x1xf32>
    %55 = vector.broadcast %54 : vector<1x4x1xf32> to vector<1x4x8xf32>
    %56 = arith.addf %53, %55 : vector<1x4x8xf32>
    %cst_39 = arith.constant 0.000000e+00 : f32
    %57 = vector.broadcast %cst_39 : f32 to vector<1x4x8xf32>
    %58 = arith.maximumf %56, %57 : vector<1x4x8xf32>
    %59 = arith.truncf %58 : vector<1x4x8xf32> to vector<1x4x8xbf16>
    %c0_40 = arith.constant 0 : index
    %c0_41 = arith.constant 0 : index
    %c24 = arith.constant 24 : index
    %60 = vector.load %arg11[%c0_40, %c0_41, %c24] : memref<1x4x64xbf16, #tpu.memory_space<vmem>>, vector<1x4x8xbf16>
    tpu.vector_store %arg11[%c0_40, %c0_41, %c24], %59 {strides = array<i32>} : memref<1x4x64xbf16, #tpu.memory_space<vmem>>, vector<1x4x8xbf16>,
    %c0_42 = arith.constant 0 : index
    %c0_43 = arith.constant 0 : index
    %c4 = arith.constant 4 : index
    %c0_44 = arith.constant 0 : index
    %61 = vector.load %arg10[%c0_42, %c0_43, %c4, %c0_44] : memref<1x4x8x8xf32, #tpu.memory_space<vmem>>, vector<1x4x1x8xf32>
    %62 = vector.shape_cast %61 : vector<1x4x1x8xf32> to vector<1x4x8xf32>
    %63 = vector.shape_cast %11 : vector<4x1xf32> to vector<1x4x1xf32>
    %64 = vector.broadcast %63 : vector<1x4x1xf32> to vector<1x4x8xf32>
    %65 = arith.mulf %62, %64 : vector<1x4x8xf32>
    %66 = vector.shape_cast %12 : vector<4x1xf32> to vector<1x4x1xf32>
    %67 = vector.broadcast %66 : vector<1x4x1xf32> to vector<1x4x8xf32>
    %68 = arith.addf %65, %67 : vector<1x4x8xf32>
    %cst_45 = arith.constant 0.000000e+00 : f32
    %69 = vector.broadcast %cst_45 : f32 to vector<1x4x8xf32>
    %70 = arith.maximumf %68, %69 : vector<1x4x8xf32>
    %71 = arith.truncf %70 : vector<1x4x8xf32> to vector<1x4x8xbf16>
    %c0_46 = arith.constant 0 : index
    %c0_47 = arith.constant 0 : index
    %c32 = arith.constant 32 : index
    %72 = vector.load %arg11[%c0_46, %c0_47, %c32] : memref<1x4x64xbf16, #tpu.memory_space<vmem>>, vector<1x4x8xbf16>
    tpu.vector_store %arg11[%c0_46, %c0_47, %c32], %71 {strides = array<i32>} : memref<1x4x64xbf16, #tpu.memory_space<vmem>>, vector<1x4x8xbf16>,
    %c0_48 = arith.constant 0 : index
    %c0_49 = arith.constant 0 : index
    %c5 = arith.constant 5 : index
    %c0_50 = arith.constant 0 : index
    %73 = vector.load %arg10[%c0_48, %c0_49, %c5, %c0_50] : memref<1x4x8x8xf32, #tpu.memory_space<vmem>>, vector<1x4x1x8xf32>
    %74 = vector.shape_cast %73 : vector<1x4x1x8xf32> to vector<1x4x8xf32>
    %75 = vector.shape_cast %11 : vector<4x1xf32> to vector<1x4x1xf32>
    %76 = vector.broadcast %75 : vector<1x4x1xf32> to vector<1x4x8xf32>
    %77 = arith.mulf %74, %76 : vector<1x4x8xf32>
    %78 = vector.shape_cast %12 : vector<4x1xf32> to vector<1x4x1xf32>
    %79 = vector.broadcast %78 : vector<1x4x1xf32> to vector<1x4x8xf32>
    %80 = arith.addf %77, %79 : vector<1x4x8xf32>
    %cst_51 = arith.constant 0.000000e+00 : f32
    %81 = vector.broadcast %cst_51 : f32 to vector<1x4x8xf32>
    %82 = arith.maximumf %80, %81 : vector<1x4x8xf32>
    %83 = arith.truncf %82 : vector<1x4x8xf32> to vector<1x4x8xbf16>
    %c0_52 = arith.constant 0 : index
    %c0_53 = arith.constant 0 : index
    %c40 = arith.constant 40 : index
    %84 = vector.load %arg11[%c0_52, %c0_53, %c40] : memref<1x4x64xbf16, #tpu.memory_space<vmem>>, vector<1x4x8xbf16>
    tpu.vector_store %arg11[%c0_52, %c0_53, %c40], %83 {strides = array<i32>} : memref<1x4x64xbf16, #tpu.memory_space<vmem>>, vector<1x4x8xbf16>,
    %c0_54 = arith.constant 0 : index
    %c0_55 = arith.constant 0 : index
    %c6 = arith.constant 6 : index
    %c0_56 = arith.constant 0 : index
    %85 = vector.load %arg10[%c0_54, %c0_55, %c6, %c0_56] : memref<1x4x8x8xf32, #tpu.memory_space<vmem>>, vector<1x4x1x8xf32>
    %86 = vector.shape_cast %85 : vector<1x4x1x8xf32> to vector<1x4x8xf32>
    %87 = vector.shape_cast %11 : vector<4x1xf32> to vector<1x4x1xf32>
    %88 = vector.broadcast %87 : vector<1x4x1xf32> to vector<1x4x8xf32>
    %89 = arith.mulf %86, %88 : vector<1x4x8xf32>
    %90 = vector.shape_cast %12 : vector<4x1xf32> to vector<1x4x1xf32>
    %91 = vector.broadcast %90 : vector<1x4x1xf32> to vector<1x4x8xf32>
    %92 = arith.addf %89, %91 : vector<1x4x8xf32>
    %cst_57 = arith.constant 0.000000e+00 : f32
    %93 = vector.broadcast %cst_57 : f32 to vector<1x4x8xf32>
    %94 = arith.maximumf %92, %93 : vector<1x4x8xf32>
    %95 = arith.truncf %94 : vector<1x4x8xf32> to vector<1x4x8xbf16>
    %c0_58 = arith.constant 0 : index
    %c0_59 = arith.constant 0 : index
    %c48 = arith.constant 48 : index
    %96 = vector.load %arg11[%c0_58, %c0_59, %c48] : memref<1x4x64xbf16, #tpu.memory_space<vmem>>, vector<1x4x8xbf16>
    tpu.vector_store %arg11[%c0_58, %c0_59, %c48], %95 {strides = array<i32>} : memref<1x4x64xbf16, #tpu.memory_space<vmem>>, vector<1x4x8xbf16>,
    %c0_60 = arith.constant 0 : index
    %c0_61 = arith.constant 0 : index
    %c7 = arith.constant 7 : index
    %c0_62 = arith.constant 0 : index
    %97 = vector.load %arg10[%c0_60, %c0_61, %c7, %c0_62] : memref<1x4x8x8xf32, #tpu.memory_space<vmem>>, vector<1x4x1x8xf32>
    %98 = vector.shape_cast %97 : vector<1x4x1x8xf32> to vector<1x4x8xf32>
    %99 = vector.shape_cast %11 : vector<4x1xf32> to vector<1x4x1xf32>
    %100 = vector.broadcast %99 : vector<1x4x1xf32> to vector<1x4x8xf32>
    %101 = arith.mulf %98, %100 : vector<1x4x8xf32>
    %102 = vector.shape_cast %12 : vector<4x1xf32> to vector<1x4x1xf32>
    %103 = vector.broadcast %102 : vector<1x4x1xf32> to vector<1x4x8xf32>
    %104 = arith.addf %101, %103 : vector<1x4x8xf32>
    %cst_63 = arith.constant 0.000000e+00 : f32
    %105 = vector.broadcast %cst_63 : f32 to vector<1x4x8xf32>
    %106 = arith.maximumf %104, %105 : vector<1x4x8xf32>
    %107 = arith.truncf %106 : vector<1x4x8xf32> to vector<1x4x8xbf16>
    %c0_64 = arith.constant 0 : index
    %c0_65 = arith.constant 0 : index
    %c56 = arith.constant 56 : index
    %108 = vector.load %arg11[%c0_64, %c0_65, %c56] : memref<1x4x64xbf16, #tpu.memory_space<vmem>>, vector<1x4x8xbf16>
    tpu.vector_store %arg11[%c0_64, %c0_65, %c56], %107 {strides = array<i32>} : memref<1x4x64xbf16, #tpu.memory_space<vmem>>, vector<1x4x8xbf16>,
    %c0_66 = arith.constant 0 : index
    %c0_67 = arith.constant 0 : index
    %c0_68 = arith.constant 0 : index
    %109 = vector.load %arg11[%c0_66, %c0_67, %c0_68] : memref<1x4x64xbf16, #tpu.memory_space<vmem>>, vector<1x4x64xbf16>
    %c0_69 = arith.constant 0 : index
    %c0_70 = arith.constant 0 : index
    %110 = vector.load %arg5[%c0_69, %c0_70] : memref<8x4xbf16, #tpu.memory_space<vmem>>, vector<8x4xbf16>
    %111 = vector.shape_cast %110 : vector<8x4xbf16> to vector<1x8x4xbf16>
    %cst_71 = arith.constant dense<0.000000e+00> : vector<1x8x64xf32>
    %112 = tpu.matmul %111, %109, %cst_71 {dimension_numbers = #tpu.dot_dimension_numbers<[2], [1], [1], [2], [0, 0, 0, 1, 1, 2], [0], [0]>} : vector<1x8x4xbf16>, vector<1x4x64xbf16>, vector<1x8x64xf32> -> vector<1x8x64xf32>
    %c0_72 = arith.constant 0 : index
    %c0_73 = arith.constant 0 : index
    %113 = vector.load %arg6[%c0_72, %c0_73] : memref<8x1xf32, #tpu.memory_space<vmem>>, vector<8x1xf32>
    %114 = vector.shape_cast %113 : vector<8x1xf32> to vector<1x8x1xf32>
    %115 = vector.broadcast %114 : vector<1x8x1xf32> to vector<1x8x64xf32>
    %116 = arith.addf %112, %115 : vector<1x8x64xf32>
    %c0_74 = arith.constant 0 : index
    %c0_75 = arith.constant 0 : index
    %c0_76 = arith.constant 0 : index
    %117 = vector.load %arg8[%c0_74, %c0_75, %c0_76] : memref<1x8x64xbf16, #tpu.memory_space<vmem>>, vector<1x8x64xbf16>
    %118 = arith.extf %117 : vector<1x8x64xbf16> to vector<1x8x64xf32>
    %119 = arith.addf %116, %118 : vector<1x8x64xf32>
    %c0_77 = arith.constant 0 : index
    %c0_78 = arith.constant 0 : index
    %c0_79 = arith.constant 0 : index
    %120 = vector.load %arg9[%c0_77, %c0_78, %c0_79] : memref<1x8x64xf32, #tpu.memory_space<vmem>>, vector<1x8x64xf32>
    tpu.vector_store %arg9[%c0_77, %c0_78, %c0_79], %119 {strides = array<i32>} : memref<1x8x64xf32, #tpu.memory_space<vmem>>, vector<1x8x64xf32>,
    return
  }
  func.func @transform_0(%arg0: i32) -> (i32, i32) {
    %c0_i32 = arith.constant 0 : i32
    %c0_i32_0 = arith.constant 0 : i32
    %c0_i32_1 = arith.constant 0 : i32
    return %c0_i32, %c0_i32_0 : i32, i32
  }
  func.func @transform_1(%arg0: i32) -> (i32, i32) {
    %c0_i32 = arith.constant 0 : i32
    %c0_i32_0 = arith.constant 0 : i32
    %c0_i32_1 = arith.constant 0 : i32
    return %c0_i32, %c0_i32_0 : i32, i32
  }
  func.func @transform_2(%arg0: i32) -> (i32, i32) {
    %c0_i32 = arith.constant 0 : i32
    %c0_i32_0 = arith.constant 0 : i32
    %c0_i32_1 = arith.constant 0 : i32
    return %c0_i32, %c0_i32_0 : i32, i32
  }
  func.func @transform_3(%arg0: i32) -> (i32, i32) {
    %c0_i32 = arith.constant 0 : i32
    %c0_i32_0 = arith.constant 0 : i32
    %c0_i32_1 = arith.constant 0 : i32
    return %c0_i32, %c0_i32_0 : i32, i32
  }
  func.func @transform_4(%arg0: i32) -> (i32, i32) {
    %c0_i32 = arith.constant 0 : i32
    %c0_i32_0 = arith.constant 0 : i32
    %c0_i32_1 = arith.constant 0 : i32
    return %c0_i32, %c0_i32_0 : i32, i32
  }
  func.func @transform_5(%arg0: i32) -> (i32, i32) {
    %c0_i32 = arith.constant 0 : i32
    %c0_i32_0 = arith.constant 0 : i32
    %c0_i32_1 = arith.constant 0 : i32
    return %c0_i32, %c0_i32_0 : i32, i32
  }
  func.func @transform_6(%arg0: i32) -> (i32, i32, i32, i32) {
    %c0_i32 = arith.constant 0 : i32
    %c0_i32_0 = arith.constant 0 : i32
    %c0_i32_1 = arith.constant 0 : i32
    %c0_i32_2 = arith.constant 0 : i32
    return %arg0, %c0_i32, %c0_i32_0, %c0_i32_1 : i32, i32, i32, i32
  }
  func.func @transform_7(%arg0: i32) -> (i32, i32, i32) {
    %c0_i32 = arith.constant 0 : i32
    %c0_i32_0 = arith.constant 0 : i32
    %c0_i32_1 = arith.constant 0 : i32
    return %arg0, %c0_i32, %c0_i32_0 : i32, i32, i32
  }
  func.func @transform_8(%arg0: i32) -> (i32, i32, i32) {
    %c0_i32 = arith.constant 0 : i32
    %c0_i32_0 = arith.constant 0 : i32
    %c0_i32_1 = arith.constant 0 : i32
    return %arg0, %c0_i32, %c0_i32_0 : i32, i32, i32
  }
}

</mosaic_0001>

<bundles_post_ra>
// kernel: tpu_custom_call.1
= control target key start
LH: loop header
LB: loop body
LE: loop exit
PB: predicated region body
PF: predicated region fallthrough
CT: control target
= control target key end

     0   :  { %13 = vsyncpa [#allocation5], 0  ;;  %s2448_s0 = inlined_call_operand.vmem [shape: f32[8,16], index: 0, kind: input, shape index: {}]   ;;  %s2449_s1 = inlined_call_operand.vmem [shape: bf16[16,8], index: 1, kind: input, shape index: {}]   ;;  %s2450_s2 = inlined_call_operand.vmem [shape: f32[4,1], index: 2, kind: input, shape index: {}]   ;;  %s2451_s3 = inlined_call_operand.vmem [shape: f32[4,1], index: 3, kind: input, shape index: {}]   ;;  %s2452_s4 = inlined_call_operand.vmem [shape: bf16[8,4], index: 4, kind: input, shape index: {}]   ;;  %s2453_s5 = inlined_call_operand.vmem [shape: f32[8,1], index: 5, kind: input, shape index: {}]   ;;  %s2454_s6 = inlined_call_operand.hbm [shape: bf16[2,4,16,16], index: 6, kind: input, shape index: {}]   ;;  %s2455_s7 = inlined_call_operand.vmem [shape: bf16[2,8,64], index: 7, kind: input, shape index: {}]   ;;  %s2456_s8 = inlined_call_operand.hbm [shape: f32[2,8,64], index: 8, kind: output, shape index: {}]  }
   0x1   :  { %15 = vsyncpa [#allocation5 + $0x1], 0 }
   0x2   :  { %16 = vsyncpa [#allocation6], 0 }
   0x3   :  { %18 = vsyncpa [#allocation6 + $0x1], 0  ;;  %s2063_s27 = smov 0   ;;  %s2065_s28 = smov 0  }
   0x4   :  { %s2067_s29 = smov 0   ;;  %s2069_s30 = smov 0  }
   0x5 LB: > { %s2084_s9 = sadd.s32 4294967295, %s2001_s30   ;;  %s1751_s10 = sadd.s32 4294967294, %s2001_s30   ;;  %s2001_s30 = sphi %s2069_s30, %s2473_s30   ;;  %s1997_s29 = sphi %s2067_s29, %s2472_s29   ;;  %s1993_s28 = sphi %s2065_s28, %s2471_s28   ;;  %s1989_s27 = sphi %s2063_s27, %s2470_s27  }
   0x6   : > { %s2088_s11 = sadd.s32 1, %s2001_s30   ;;  %s157_s12 = sadd.s32 1, %s1997_s29 }
   0x7   : > { %s154_s13 = ssub.s32 %s2001_s30, %s2088_s11  ;;  %p164_p0 = scmp.ne.s32.totalorder %s1997_s29, %s1993_s28 }
   0x8   : > { %p155_p1 = scmp.eq.s32.totalorder %s154_s13, 0  ;;  %p165_p2 = scmp.eq.s32.totalorder %s2001_s30, 0 }
   0x9   : > { %p170_p3 = scmp.ne.s32.totalorder %s1993_s28, %s1989_s27  ;;  %p171_p4 = scmp.eq.s32.totalorder %s2084_s9, 0 }
   0xa   : > { %s2100_s14 = scalar_select %p155_p1, %s1997_s29, %s157_s12  }
   0xb   : > { %p2102_p5 = por %p165_p2, %p164_p0  ;;  %p2106_p6 = por %p171_p4, %p170_p3 }
   0xc   : > { %2459 = sst [smem:[#allocation10_spill]] %s2100_s14  ;;  %p220_p7 = scmp.eq.s32.totalorder %s2084_s9, 1 }
   0xd   : > { %s2461_s16 = scalar_select %p2106_p6, 1, 0 }
   0xe   : > { %p226_p8 = scmp.eq.s32.totalorder %s1751_s10, 1  ;;  %p1855_p10 = scmp.lt.s32.totalorder %s2001_s30, 2 }
   0xf   : > { %p2113_p11 = por %p220_p7, %p164_p0  ;;  %s264_s19 = sand.u32 1, %s1997_s29  }
  0x10   : > { %p2117_p12 = por %p226_p8, %p170_p3  ;;  %s1779_s20 = sshll.u32 %s2001_s30, 9 }
  0x11   : > { %s2462_s17 = scalar_select %p2113_p11, 1, 0 }
  0x12   : > { %s2463_s18 = scalar_select %p2117_p12, 1, 0 }
  0x13   : > { %s1754_s21 = sshll.u32 %s264_s19, 5  ;;  %s2126_s24 = scalar_lea.hbm %s2454_s6, %s1779_s20 }
  0x14   : > { %s268_s25 = scalar_lea.vmem [#allocation4], %s1754_s21  ;;  %p2130_p13 = pnand %p1855_p10, %p2102_p5 }
  0x15   : > { %s275_s26 = sshll.u32 %s268_s25, 4  ;;  %s2136_s12 = scalar_lea.sflag [#allocation5], %s264_s19  ;;  %s2134_s26 = int_to_ptr.vmem [resolvable:$true] %s275_s26 }
  0x16   : > { %s1909_s13 = scalar_lea.hbm %s2126_s24, 512  ;;  %p1911_p1 = pneg %p2130_p13 }
  0x17   : > { %p1910_p0 = scmp.ne.s32.totalorder %s2126_s24, %s1909_s13  ;;  %s1914_s21 = scalar_lea.hbm %s2454_s6, 1024 }
  0x18   : > { %p1915_p4 = scmp.lt.s32.totalorder %s2126_s24, %s2454_s6  ;;  %p1916_p5 = scmp.lt.s32.totalorder %s1914_s21, %s1909_s13 }
  0x19   : > { %p1912_p2 = pnand %p1911_p1, %p1910_p0 }
  0x1a   : > { %p1917_p7 = por %p1916_p5, %p1915_p4 }
  0x1b   : > { %p1913_p3 = pneg %p1912_p2 }
  0x1d   : > { %p1918_p8 = pnand %p1917_p7, %p1913_p3 }
  0x1f   : > { %1921 = shalt.err (!%p1918_p8)
}
  0x20   : > { %s1922_s19 = scalar_lea.vmem %s2134_s26, 512  ;;  %s2003_s25 = smov [#allocation4]  }
  0x21   : > { %p1923_p10 = scmp.ne.s32.totalorder %s2134_s26, %s1922_s19  ;;  %s1927_s14 = sshll.u32 %s2003_s25, 4  ;;  %s1928_s14 = int_to_ptr.vmem [resolvable:$false] %s1927_s14 }
  0x22   : > { %s1929_s20 = scalar_lea.vmem %s1928_s14, 1024  ;;  %p1930_p2 = scmp.lt.s32.totalorder %s2134_s26, %s1928_s14 }
  0x23   : > { %p1925_p9 = pnand %p1923_p10, %p1911_p1  ;;  %p1931_p12 = scmp.lt.s32.totalorder %s1929_s20, %s1922_s19 }
  0x25   : > { %p1926_p0 = pneg %p1925_p9  ;;  %p1932_p11 = por %p1931_p12, %p1930_p2 }
  0x27   : > { %p1933_p6 = pnand %p1932_p11, %p1926_p0 }
  0x29   : > { %1936 = shalt.err (!%p1933_p6)
}
  0x2a   : > { %s2004_s13 = smov 64   ;;  %s2005_s22 = smov 4  }
  0x2b   : > { %1850 = dma.hbm_to_vmem [thread:$0]  (!%p2130_p13), %s2126_s24, 512, %s2134_s26, %s2136_s12, %s2004_s13, %s2004_s13, %s2005_s22  }
  0x2c   : > { %p1757_p9 = scmp.ge.s32.totalorder %s2001_s30, 1  ;;  %p290_p1 = scmp.lt.s32.totalorder %s2001_s30, 3 }
  0x2e   : > { %p291_p3 = pnand %p1757_p9, %p290_p1 }
  0x2f   : > { %s2160_s14 = sand.u32 (!%p291_p3), 1, %s1993_s28   ;;  %p2465_p6 = scmp.ne.s32.totalorder (!%p291_p3), %s2461_s16, 0 }
  0x30   : > { %294 = sbr.rel (%p291_p3) target bundleno = 875 (0x36b), region = 52  ;;  %s1758_s21 = sshll.u32 (!%p291_p3), %s2160_s14, 5 }
  0x31   : > { %s297_s15 = scalar_lea.sflag (!%p291_p3), [#allocation5], %s2160_s14  ;;  %s300_s23 = scalar_lea.vmem (!%p291_p3), [#allocation4], %s1758_s21 }
  0x35   : > { %1980 = dma.done.wait (%p2465_p6), %s297_s15, 512  }
  0x36   : > { %1982 = vsyncadd (%p2465_p6), %s297_s15, 4294966784  ;;  %v1904_v0 = vld [vmem:[%s2449_s1] sm:$0xff]   ;;  %vm378_vm0 = vcmask 130048   ;;  %v1906_v2 = vld [vmem:[%s300_s23 + $0x8] sm:$0xff]   ;;  %v2006_v5 = vmov 0.0   ;;  %vm2007_vm1 = vmmov 0   ;;  %v796_v23 = vlaneseq }
  0x37   : > { %v1905_v1 = vld [vmem:[%s300_s23] sm:$0xff]   ;;  %1799 = vmatprep.subr.bf16.mxu0 %v1904_v0  ;;  %v1907_v3 = vld [vmem:[%s300_s23 + $0x10] sm:$0xff]   ;;  %v1908_v4 = vld [vmem:[%s300_s23 + $0x18] sm:$0xff]   ;;  %1809 = vmatprep.subr.mxu1 %v2006_v5  ;;  %v2008_v7 = vmov 0   ;;  %vm740_vm2 = vcmask 64512   ;;  %vm854_vm3 = vcmask 1041409  }
  0x38   : > { %1800 = vmatpush3.bf16.msra.mxu0 %v1904_v0  ;;  %1801 = vmatprep.mubr.msk.bf16.mxu0 %vm378_vm0, %v1905_v1  ;;  %v745_v6 = vld [vmem:[%s2450_s2] sm:$0xf]  ;;  %v2009_v21 = vmov 1983009808   ;;  %v797_v30 = vshrl.u32 %v796_v23, 7  ;;  %vm857_vm4 = vcmask 1042434  }
  0x39   : > { %1837 = vmatprep.subr.bf16.mxu0 %v2006_v5  ;;  %1813 = vmatprep.mubr.msk.f32.mxu1 %vm2007_vm1, %v2006_v5  ;;  %v746_v8 = vld [vmem:[%s2451_s3] sm:$0xf]  ;;  %v794_v22 = vunpack.c.l.s4 %v2009_v21  ;;  %vm860_vm5 = vcmask 1043459   ;;  %s2010_s13 = smov 24   ;;  %s2011_s22 = smov 8   ;;  %vm871_vm6 = vcmask 58368  }
  0x3a   : > { %1902 = vset.pattern.permute.xlu0 %v2008_v7  ;;  %1903 = vset.pattern.permute.xlu1 %v2008_v7  ;;  %v456_v13 = vld [vmem:[%s2448_s0] sm:$0xff]  ;;  %s2012_s21 = smov 40   ;;  %s2013_s15 = smov 16   ;;  %vm974_vm7 = vcmask 123968   ;;  %vm1077_vm8 = vcmask 189568   ;;  %vm1180_vm9 = vcmask 255168  }
  0x3b   : > { %1802 = vmatmul.mubr.msk.bf16.vlgmr.msra.gmra.mxu0 %vm378_vm0, %v1906_v2  ;;  %753 = vperm.xlu0 %1902, %v745_v6   ;;  %v795_v29 = vunpack.c.0.s8 %v794_v22  ;;  %s2014_s23 = smov 56   ;;  %s2015_s10 = smov 32   ;;  %vm1283_vm10 = vcmask 320768   ;;  %vm1386_vm11 = vcmask 386368   ;;  %vm1489_vm12 = vcmask 451968  }
  0x3c   : > { %1805 = vmatprep.mubr.msk.bf16.mxu0 %vm378_vm0, %v1907_v3  ;;  %s2016_s24 = smov 48   ;;  %vm1592_vm13 = vcmask 517568   ;;  %vm1606_vm14 = vcmask 1041408   ;;  %vm1602_vm15 = vcmask 31744   ;;  %p337_p11 = scmp.lt.s32.totalorder %s2084_s9, 1 }
  0x3d   : > { %v2213_v46 = vsub.s32 %v795_v29, %v797_v30  ;;  %p2466_p13 = scmp.ne.s32.totalorder %s2462_s17, 0 }
  0x3e   : > { %s338_s25 = scalar_select %p337_p11, %s2084_s9, 1 }
  0x3f   : > { %768 = vperm.xlu0 %1902, %v746_v8  }
  0x40   : > { %s1760_s20 = sshll.u32 %s338_s25, 2  ;;  %s2017_s25 = smov [#allocation7]  }
  0x43   : > { %1806 = vmatmul.mubr.msk.bf16.gmra.mxu0 %vm378_vm0, %v1908_v4 }
  0x44   : > { %1839 = vmatprep.mubr.msk.bf16.mxu0 %vm2007_vm1, %v2006_v5 }
  0xb6   : > { %v754_v19 = vpop.permute.xlu0 %753 }
  0xb7   : > { %v2195_v25 = vrot.slane %v754_v19, 1  ;;  %v2197_v26 = vrot.slane %v754_v19, 2  ;;  %v2201_v31 = vrot.slane %v754_v19, 3 }
  0xba   : > { %v2199_v28 = vpop.permute.xlu0 %768 }
  0xbb   : > { %v2204_v32 = vrot.slane %v2199_v28, 1  ;;  %v2207_v33 = vrot.slane %v2199_v28, 2  ;;  %v2210_v34 = vrot.slane %v2199_v28, 3 }
  0xfb   : > { %v1803_v9 = vpop.f32.mrf.mxu0 }
  0xfd   : > { %v425_v10 = vpop.f32.mrf.mxu0 }
  0xff   : > { %v1804_v11 = vpop.f32.mrf.mxu0 }
 0x101   : > { %v428_v12 = vpop.f32.mrf.mxu0 }
 0x102   : > { %1810 = vmatpush3.msra.mxu1 %v428_v12 }
 0x103   : > { %v1807_v14 = vpop.f32.mrf.mxu0  ;;  %1811 = vmatprep.subr.mxu1 %v2006_v5 }
 0x104   : > { %1812 = vmatpush3.msra.mxu1 %v425_v10 }
 0x105   : > { %v441_v15 = vpop.f32.mrf.mxu0  ;;  %1814 = vmatmul.mubr.msk.f32.vlgmr.msra.gmra.mxu1 %vm378_vm0, %v456_v13  ;;  %1816 = vmatprep.subr.mxu1 %v2006_v5 }
 0x106   : > { %1817 = vmatpush3.msra.mxu1 %v1804_v11  ;;  %1820 = vmatprep.mubr.msk.f32.mxu1 %vm2007_vm1, %v2006_v5 }
 0x107   : > { %v1808_v16 = vpop.f32.mrf.mxu0  ;;  %1818 = vmatprep.subr.mxu1 %v2006_v5 }
 0x108   : > { %1819 = vmatpush3.msra.mxu1 %v1803_v9 }
 0x109   : > { %v444_v17 = vpop.f32.mrf.mxu0  ;;  %1821 = vmatmul.mubr.msk.f32.vlgmr.msra.gmra.mxu1 %vm378_vm0, %v456_v13  ;;  %1823 = vmatprep.subr.mxu1 %v2006_v5 }
 0x10a   : > { %1824 = vmatpush3.msra.mxu1 %v444_v17  ;;  %1827 = vmatprep.mubr.msk.f32.mxu1 %vm2007_vm1, %v2006_v5 }
 0x10b   : > { %1825 = vmatprep.subr.mxu1 %v2006_v5 }
 0x10c   : > { %1826 = vmatpush3.msra.mxu1 %v441_v15 }
 0x10d   : > { %1828 = vmatmul.mubr.msk.f32.vlgmr.msra.gmra.mxu1 %vm378_vm0, %v456_v13  ;;  %1830 = vmatprep.subr.mxu1 %v2006_v5 }
 0x10e   : > { %1831 = vmatpush3.msra.mxu1 %v1808_v16  ;;  %1834 = vmatprep.mubr.msk.f32.mxu1 %vm2007_vm1, %v2006_v5 }
 0x10f   : > { %1832 = vmatprep.subr.mxu1 %v2006_v5 }
 0x110   : > { %1833 = vmatpush3.msra.mxu1 %v1807_v14 }
 0x111   : > { %1835 = vmatmul.mubr.msk.f32.vlgmr.msra.gmra.mxu1 %vm378_vm0, %v456_v13  ;;  %vm1653_vm0 = vcmask 523264  }
 0x1c5   : > { %v526_v18 = vpop.f32.mrf.mxu1 }
 0x1c6   : > { %741 = vst.msk [vmem:[#allocation2] sm:$0xff] %vm740_vm2, %v526_v18 }
 0x1c7   : > { %v1815_v20 = vpop.f32.mrf.mxu1 }
 0x1c9   : > { %v596_v24 = vpop.f32.mrf.mxu1 }
 0x1ca   : > { %742 = vst.msk [vmem:[#allocation2 + $0x8] sm:$0xff] %vm740_vm2, %v596_v24 }
 0x1cb   : > { %v1822_v27 = vpop.f32.mrf.mxu1 }
 0x1cd   : > { %v666_v35 = vpop.f32.mrf.mxu1  ;;  %v1079_v36 = vld [vmem:[#allocation2 + $0x3] sm:$0x1]  ;;  %v873_v37 = vld [vmem:[#allocation2 + $0x1] sm:$0x1]  ;;  %v1285_v38 = vld [vmem:[#allocation2 + $0x5] sm:$0x1] }
 0x1ce   : > { %743 = vst.msk [vmem:[#allocation2 + $0x10] sm:$0xff] %vm740_vm2, %v666_v35  ;;  %v1083_v39 = vmul.f32 %v1079_v36, %v754_v19  ;;  %v877_v40 = vmul.f32 %v873_v37, %v754_v19  ;;  %v1289_v41 = vmul.f32 %v1285_v38, %v754_v19  ;;  %v976_v42 = vld [vmem:[#allocation2 + $0x2] sm:$0x1]  ;;  %v1491_v43 = vld [vmem:[#allocation2 + $0x7] sm:$0x1] }
 0x1cf   : > { %v1182_v44 = vld [vmem:[#allocation2 + $0x4] sm:$0x1]  ;;  %v1829_v45 = vpop.f32.mrf.mxu1  ;;  %v980_v47 = vmul.f32 %v976_v42, %v754_v19  ;;  %v1495_v48 = vmul.f32 %v1491_v43, %v754_v19  ;;  %v1388_v50 = vld [vmem:[#allocation2 + $0x6] sm:$0x1]  ;;  %v747_v51 = vld [vmem:[#allocation2] sm:$0x1] }
 0x1d0   : > { %v1186_v49 = vmul.f32 %v1182_v44, %v754_v19  ;;  %v1087_v52 = vadd.f32 %v1083_v39, %v2199_v28  ;;  %v881_v53 = vadd.f32 %v877_v40, %v2199_v28  ;;  %v1293_v54 = vadd.f32 %v1289_v41, %v2199_v28 }
 0x1d1   : > { %v2218_v55 = vmul.f32 %v1388_v50, %v754_v19  ;;  %v736_v56 = vpop.f32.mrf.mxu1  ;;  %v1080_v57 = vld [vmem:[#allocation2 + $0xb] sm:$0x1]  ;;  %v874_v58 = vld [vmem:[#allocation2 + $0x9] sm:$0x1]  ;;  %v1286_v59 = vld [vmem:[#allocation2 + $0xd] sm:$0x1]  ;;  %v984_v60 = vadd.f32 %v980_v47, %v2199_v28  ;;  %v2222_v61 = vadd.f32 %v1495_v48, %v2199_v28  ;;  %v2227_v63 = vmul.f32 %v754_v19, %v747_v51 }
 0x1d2   : > { %v2225_v62 = vadd.f32 %v1186_v49, %v2199_v28  ;;  %744 = vst.msk [vmem:[#allocation2 + $0x18] sm:$0xff] %vm740_vm2, %v736_v56  ;;  %v1084_v0 = vmul.f32 %v1080_v57, %v2195_v25  ;;  %v1091_v1 = vmax.f32 %v1087_v52, 0.0  ;;  %v878_v2 = vmul.f32 %v874_v58, %v2195_v25  ;;  %v977_v4 = vld [vmem:[#allocation2 + $0xa] sm:$0x1] }
 0x1d3   : > { %v885_v3 = vmax.f32 %v881_v53, 0.0  ;;  %v1836_v5 = vpop.f32.mrf.mxu1  ;;  %v1290_v6 = vmul.f32 %v1286_v59, %v2195_v25  ;;  %v1297_v7 = vmax.f32 %v1293_v54, 0.0  ;;  %v981_v8 = vmul.f32 %v977_v4, %v2195_v25 }
 0x1d4   : > { %v988_v9 = vmax.f32 %v984_v60, 0.0  ;;  %v1088_v10 = vadd.f32 %v1084_v0, %v2204_v32  ;;  %v1095_v11 = vpack.c.bf16 %v1091_v1, %v1091_v1  ;;  %v882_v12 = vadd.f32 %v878_v2, %v2204_v32 }
 0x1d5   : > { %v889_v13 = vpack.c.bf16 %v885_v3, %v885_v3  ;;  %v1081_v14 = vld [vmem:[#allocation2 + $0x13] sm:$0x1]  ;;  %v875_v15 = vld [vmem:[#allocation2 + $0x11] sm:$0x1]  ;;  %v1287_v16 = vld [vmem:[#allocation2 + $0x15] sm:$0x1]  ;;  %v1294_v17 = vadd.f32 %v1290_v6, %v2204_v32  ;;  %v2237_v18 = vpack.c.bf16 %v1297_v7, %v1297_v7  ;;  %v2240_v19 = vadd.f32 %v981_v8, %v2204_v32 }
 0x1d6   : > { %v2242_v20 = vpack.c.bf16 %v988_v9, %v988_v9  ;;  %v1085_v21 = vmul.f32 %v1081_v14, %v2197_v26  ;;  %v1092_v22 = vmax.f32 %v1088_v10, 0.0  ;;  %v1109_v23 = vrot.slane %v1095_v11, %v2213_v46 }
 0x1d7   : > { %v879_v24 = vmul.f32 %v875_v15, %v2197_v26  ;;  %v886_v27 = vmax.f32 %v882_v12, 0.0  ;;  %v903_v29 = vrot.slane %v889_v13, %v2213_v46  ;;  %v1291_v30 = vmul.f32 %v1287_v16, %v2197_v26 }
 0x1d8   : > { %v1298_v35 = vmax.f32 %v1294_v17, 0.0  ;;  %v1089_v36 = vadd.f32 %v1085_v21, %v2207_v33  ;;  %v1096_v37 = vpack.c.bf16 %v1092_v22, %v1092_v22  ;;  %v1137_v38 = vrot.slane %v1109_v23, %v2213_v46 }
 0x1d9   : > { %v883_v39 = vadd.f32 %v879_v24, %v2207_v33  ;;  %v1082_v40 = vld [vmem:[#allocation2 + $0x1b] sm:$0x1]  ;;  %v876_v41 = vld [vmem:[#allocation2 + $0x19] sm:$0x1]  ;;  %v890_v42 = vpack.c.bf16 %v886_v27, %v886_v27  ;;  %v931_v43 = vrot.slane %v903_v29, %v2213_v46  ;;  %v1288_v44 = vld [vmem:[#allocation2 + $0x1d] sm:$0x1]  ;;  %v1295_v45 = vadd.f32 %v1291_v30, %v2207_v33 }
 0x1da   : > { %v1302_v47 = vpack.c.bf16 %v1298_v35, %v1298_v35  ;;  %v1086_v48 = vmul.f32 %v1082_v40, %v2201_v31  ;;  %v1093_v49 = vmax.f32 %v1089_v36, 0.0  ;;  %v1116_v50 = vrot.slane %v1096_v37, %v2213_v46 }
 0x1db   : > { %v1159_v51 = vunpack.c.l.b16 %v1137_v38  ;;  %v880_v52 = vmul.f32 %v876_v41, %v2201_v31  ;;  %v887_v53 = vmax.f32 %v883_v39, 0.0  ;;  %v910_v54 = vrot.slane %v890_v42, %v2213_v46 }
 0x1dc   : > { %v953_v56 = vunpack.c.l.b16 %v931_v43  ;;  %v1090_v57 = vadd.f32 %v1086_v48, %v2210_v34  ;;  %v1097_v58 = vpack.c.bf16 %v1093_v49, %v1093_v49  ;;  %v1144_v59 = vrot.slane %v1116_v50, %v2213_v46 }
 0x1dd   : > { %v1292_v60 = vmul.f32 %v1288_v44, %v2201_v31  ;;  %v884_v0 = vadd.f32 %v880_v52, %v2210_v34  ;;  %v891_v1 = vpack.c.bf16 %v887_v53, %v887_v53  ;;  %v938_v2 = vrot.slane %v910_v54, %v2213_v46 }
 0x1de   : > { %v1299_v3 = vmax.f32 %v1295_v45, 0.0  ;;  %v1094_v4 = vmax.f32 %v1090_v57, 0.0  ;;  %v1123_v5 = vrot.slane %v1097_v58, %v2213_v46  ;;  %v1160_v6 = vunpack.c.l.b16 %v1144_v59  ;;  %v978_v45 = vld [vmem:[#allocation2 + $0x12] sm:$0x1] }
 0x1df   : > { %v1296_v7 = vadd.f32 %v1292_v60, %v2210_v34  ;;  %v888_v8 = vmax.f32 %v884_v0, 0.0  ;;  %v917_v9 = vrot.slane %v891_v1, %v2213_v46  ;;  %v954_v10 = vunpack.c.l.b16 %v938_v2 }
 0x1e0   : > { %v1303_v11 = vpack.c.bf16 %v1299_v3, %v1299_v3  ;;  %v1098_v12 = vpack.c.bf16 %v1094_v4, %v1094_v4  ;;  %v1151_v13 = vrot.slane %v1123_v5, %v2213_v46  ;;  %v1163_v14 = vrot.slane %v1160_v6, 7 }
 0x1e1   : > { %v1300_v15 = vmax.f32 %v1296_v7, 0.0  ;;  %v892_v16 = vpack.c.bf16 %v888_v8, %v888_v8  ;;  %v945_v17 = vrot.slane %v917_v9, %v2213_v46  ;;  %v957_v21 = vrot.slane %v954_v10, 7 }
 0x1e2   : > { %v1315_v22 = vrot.slane %v2237_v18, %v2213_v46  ;;  %v1130_v23 = vrot.slane %v1098_v12, %v2213_v46  ;;  %v1161_v24 = vunpack.c.l.b16 %v1151_v13  ;;  %v1164_v27 = vsel %vm854_vm3, %v1163_v14, %v1159_v51  ;;  %v979_v51 = vld [vmem:[#allocation2 + $0x1a] sm:$0x1] }
 0x1e3   : > { %v1304_v29 = vpack.c.bf16 %v1300_v15, %v1300_v15  ;;  %v924_v30 = vrot.slane %v892_v16, %v2213_v46  ;;  %v955_v35 = vunpack.c.l.b16 %v945_v17  ;;  %v958_v36 = vsel %vm854_vm3, %v957_v21, %v953_v56  ;;  %v1492_v16 = vld [vmem:[#allocation2 + $0xf] sm:$0x1] }
 0x1e4   : > { %v1322_v37 = vrot.slane %v1302_v47, %v2213_v46  ;;  %v1158_v38 = vrot.slane %v1130_v23, %v2213_v46  ;;  %v1165_v39 = vrot.slane %v1161_v24, 6  ;;  %v1329_v40 = vrot.slane %v1303_v11, %v2213_v46  ;;  %v1494_v24 = vld [vmem:[#allocation2 + $0x1f] sm:$0x1] }
 0x1e5   : > { %v1336_v18 = vrot.slane %v1304_v29, %v2213_v46  ;;  %v952_v41 = vrot.slane %v924_v30, %v2213_v46  ;;  %v959_v42 = vrot.slane %v955_v35, 6  ;;  %v1343_v43 = vrot.slane %v1315_v22, %v2213_v46 }
 0x1e6   : > { %v1350_v44 = vrot.slane %v1322_v37, %v2213_v46  ;;  %v1162_v48 = vunpack.c.l.b16 %v1158_v38  ;;  %v1166_v49 = vsel %vm857_vm4, %v1165_v39, %v1164_v27  ;;  %v1357_v47 = vrot.slane %v1329_v40, %v2213_v46 }
 0x1e7   : > { %v1364_v50 = vrot.slane %v1336_v18, %v2213_v46  ;;  %v956_v52 = vunpack.c.l.b16 %v952_v41  ;;  %v960_v53 = vsel %vm857_vm4, %v959_v42, %v958_v36  ;;  %v1365_v54 = vunpack.c.l.b16 %v1343_v43  ;;  %v1183_v42 = vld [vmem:[#allocation2 + $0xc] sm:$0x1] }
 0x1e8   : > { %v1366_v56 = vunpack.c.l.b16 %v1350_v44  ;;  %v1167_v57 = vrot.slane %v1162_v48, 5  ;;  %v1367_v58 = vunpack.c.l.b16 %v1357_v47  ;;  %v982_v60 = vmul.f32 %v978_v45, %v2197_v26 }
 0x1e9   : > { %v1368_v59 = vunpack.c.l.b16 %v1364_v50  ;;  %v961_v0 = vrot.slane %v956_v52, 5  ;;  %v983_v2 = vmul.f32 %v979_v51, %v2201_v31  ;;  %v989_v3 = vmax.f32 %v2240_v19, 0.0  ;;  %v1493_v19 = vld [vmem:[#allocation2 + $0x17] sm:$0x1]  ;;  %v1184_v52 = vld [vmem:[#allocation2 + $0x14] sm:$0x1] }
 0x1ea   : > { %v1369_v1 = vrot.slane %v1366_v56, 7  ;;  %v1168_v4 = vsel %vm860_vm5, %v1167_v57, %v1166_v49  ;;  %v1371_v5 = vrot.slane %v1367_v58, 6  ;;  %v986_v7 = vadd.f32 %v982_v60, %v2207_v33 }
 0x1eb   : > { %v1373_v6 = vrot.slane %v1368_v59, 5  ;;  %v1169_v8 = vpack.c.b16 %v1168_v4, %v1168_v4  ;;  %v962_v9 = vsel %vm860_vm5, %v961_v0, %v960_v53  ;;  %v987_v11 = vadd.f32 %v983_v2, %v2210_v34 }
 0x1ec   : > { %v1370_v10 = vsel %vm854_vm3, %v1369_v1, %v1365_v54  ;;  %v963_v12 = vpack.c.b16 %v962_v9, %v962_v9  ;;  %v990_v14 = vmax.f32 %v986_v7, 0.0  ;;  %v993_v15 = vpack.c.bf16 %v989_v3, %v989_v3  ;;  %v1185_v1 = vld [vmem:[#allocation2 + $0x1c] sm:$0x1] }
 0x1ed   : > { %v1372_v13 = vsel %vm857_vm4, %v1371_v5, %v1370_v10  ;;  %v1176_v17 = vrot.slane %v1169_v8, %v2213_v46  ;;  %v991_v22 = vmax.f32 %v987_v11, 0.0  ;;  %v1006_v23 = vrot.slane %v2242_v20, %v2213_v46 }
 0x1ee   : > { %v1374_v21 = vsel %vm860_vm5, %v1373_v6, %v1372_v13  ;;  %v970_v27 = vrot.slane %v963_v12, %v2213_v46  ;;  %v994_v30 = vpack.c.bf16 %v990_v14, %v990_v14  ;;  %v1013_v35 = vrot.slane %v993_v15, %v2213_v46 }
 0x1ef   : > { %v1375_v29 = vpack.c.b16 %v1374_v21, %v1374_v21  ;;  %1177 = vrot.lane.b32.xlu0 %v1176_v17, %s2010_s13  ;;  %v995_v36 = vpack.c.bf16 %v991_v22, %v991_v22  ;;  %v1034_v37 = vrot.slane %v1006_v23, %v2213_v46  ;;  %v1496_v38 = vmul.f32 %v1492_v16, %v2195_v25 }
 0x1f0   : > { %v1497_v39 = vmul.f32 %v1493_v19, %v2197_v26  ;;  %971 = vrot.lane.b32.xlu1 %v970_v27, %s2011_s22  ;;  %v1020_v40 = vrot.slane %v994_v30, %v2213_v46  ;;  %v1041_v18 = vrot.slane %v1013_v35, %v2213_v46  ;;  %v1498_v41 = vmul.f32 %v1494_v24, %v2201_v31 }
 0x1f1   : > { %v1382_v20 = vrot.slane %v1375_v29, %v2213_v46  ;;  %v1027_v43 = vrot.slane %v995_v36, %v2213_v46  ;;  %v1056_v44 = vunpack.c.l.b16 %v1034_v37  ;;  %v1500_v45 = vadd.f32 %v1496_v38, %v2204_v32  ;;  %v1389_v38 = vld [vmem:[#allocation2 + $0xe] sm:$0x1] }
 0x1f2   : > { %v1501_v48 = vadd.f32 %v1497_v39, %v2207_v33  ;;  %v1048_v49 = vrot.slane %v1020_v40, %v2213_v46  ;;  %v1057_v47 = vunpack.c.l.b16 %v1041_v18  ;;  %v1502_v50 = vadd.f32 %v1498_v41, %v2210_v34  ;;  %v1390_v41 = vld [vmem:[#allocation2 + $0x16] sm:$0x1] }
 0x1f3   : > { %v1503_v51 = vmax.f32 %v2222_v61, 0.0  ;;  %1383 = vrot.lane.b32.xlu0 %v1382_v20, %s2012_s21  ;;  %v1055_v53 = vrot.slane %v1027_v43, %v2213_v46  ;;  %v1504_v54 = vmax.f32 %v1500_v45, 0.0  ;;  %v1187_v57 = vmul.f32 %v1183_v42, %v2195_v25  ;;  %s340_s21 = scalar_lea.vmem %s2455_s7, %s1760_s20  ;;  %s1941_s20 = sshll.u32 %s2017_s25, 4  ;;  %s1942_s20 = int_to_ptr.vmem [resolvable:$false] %s1941_s20 }
 0x1f4   : > { %v1505_v56 = vmax.f32 %v1501_v48, 0.0  ;;  %v1058_v58 = vunpack.c.l.b16 %v1048_v49  ;;  %v1060_v59 = vrot.slane %v1057_v47, 7  ;;  %v1506_v60 = vmax.f32 %v1502_v50, 0.0  ;;  %v1391_v48 = vld [vmem:[#allocation2 + $0x1e] sm:$0x1]  ;;  %s1943_s13 = scalar_lea.vmem %s1942_s20, 256 }
 0x1f5   : > { %v1507_v0 = vpack.c.bf16 %v1503_v51, %v1503_v51  ;;  %v1059_v2 = vunpack.c.l.b16 %v1055_v53  ;;  %v1508_v3 = vpack.c.bf16 %v1504_v54, %v1504_v54  ;;  %v1188_v5 = vmul.f32 %v1184_v52, %v2197_v26 }
 0x1f6   : > { %v1509_v4 = vpack.c.bf16 %v1505_v56, %v1505_v56  ;;  %v1061_v61 = vsel %vm854_vm3, %v1060_v59, %v1056_v44  ;;  %v1062_v6 = vrot.slane %v1058_v58, 6  ;;  %v1510_v7 = vpack.c.bf16 %v1506_v60, %v1506_v60 }
 0x1f7   : > { %v1521_v8 = vrot.slane %v1507_v0, %v2213_v46  ;;  %v1064_v9 = vrot.slane %v1059_v2, 5  ;;  %v1528_v10 = vrot.slane %v1508_v3, %v2213_v46  ;;  %v1189_v12 = vmul.f32 %v1185_v1, %v2201_v31 }
 0x1f8   : > { %v1535_v11 = vrot.slane %v1509_v4, %v2213_v46  ;;  %v1063_v13 = vsel %vm857_vm4, %v1062_v6, %v1061_v61  ;;  %v1542_v14 = vrot.slane %v1510_v7, %v2213_v46  ;;  %v1191_v16 = vadd.f32 %v1187_v57, %v2204_v32 }
 0x1f9   : > { %v1549_v15 = vrot.slane %v1521_v8, %v2213_v46  ;;  %v1065_v19 = vsel %vm860_vm5, %v1064_v9, %v1063_v13  ;;  %v1556_v17 = vrot.slane %v1528_v10, %v2213_v46  ;;  %v1192_v22 = vadd.f32 %v1188_v5, %v2207_v33  ;;  %v748_v10 = vld [vmem:[#allocation2 + $0x8] sm:$0x1] }
 0x1fa   : > { %v1563_v21 = vrot.slane %v1535_v11, %v2213_v46  ;;  %v1066_v23 = vpack.c.b16 %v1065_v19, %v1065_v19  ;;  %v1570_v24 = vrot.slane %v1542_v14, %v2213_v46  ;;  %v1193_v29 = vadd.f32 %v1189_v12, %v2210_v34 }
 0x1fb   : > { %v1571_v27 = vunpack.c.l.b16 %v1549_v15  ;;  %v1572_v30 = vunpack.c.l.b16 %v1556_v17  ;;  %v1194_v36 = vmax.f32 %v2225_v62, 0.0  ;;  %v1195_v37 = vmax.f32 %v1191_v16, 0.0  ;;  %v749_v17 = vld [vmem:[#allocation2 + $0x10] sm:$0x1] }
 0x1fc   : > { %v1573_v35 = vunpack.c.l.b16 %v1563_v21  ;;  %v1073_v39 = vrot.slane %v1066_v23, %v2213_v46  ;;  %v1574_v20 = vunpack.c.l.b16 %v1570_v24  ;;  %v1196_v40 = vmax.f32 %v1192_v22, 0.0 }
 0x1fd   : > { %v1197_v18 = vmax.f32 %v1193_v29, 0.0  ;;  %v1575_v42 = vrot.slane %v1572_v30, 7  ;;  %v1198_v44 = vpack.c.bf16 %v1194_v36, %v1194_v36  ;;  %v1199_v45 = vpack.c.bf16 %v1195_v37, %v1195_v37 }
 0x1fe   : > { %v1577_v43 = vrot.slane %v1573_v35, 6  ;;  %1074 = vrot.lane.b32.xlu1 %v1073_v39, %s2013_s15  ;;  %v1579_v49 = vrot.slane %v1574_v20, 5  ;;  %v1200_v47 = vpack.c.bf16 %v1196_v40, %v1196_v40  ;;  %v1393_v62 = vmul.f32 %v1389_v38, %v2195_v25  ;;  %s1759_s15 = sshll.u32 %s2160_s14, 3 }
 0x1ff   : > { %v1201_v50 = vpack.c.bf16 %v1197_v18, %v1197_v18  ;;  %v1576_v51 = vsel %vm854_vm3, %v1575_v42, %v1571_v27  ;;  %v1212_v52 = vrot.slane %v1198_v44, %v2213_v46  ;;  %v1219_v53 = vrot.slane %v1199_v45, %v2213_v46 }
 0x200   : > { %v1394_v54 = vmul.f32 %v1390_v41, %v2197_v26  ;;  %v1578_v56 = vsel %vm857_vm4, %v1577_v43, %v1576_v51  ;;  %v1226_v57 = vrot.slane %v1200_v47, %v2213_v46  ;;  %v1395_v59 = vmul.f32 %v1391_v48, %v2201_v31  ;;  %v750_v48 = vld [vmem:[#allocation2 + $0x18] sm:$0x1] }
 0x201   : > { %v1233_v58 = vrot.slane %v1201_v50, %v2213_v46  ;;  %v1580_v60 = vsel %vm860_vm5, %v1579_v49, %v1578_v56  ;;  %v1240_v0 = vrot.slane %v1212_v52, %v2213_v46  ;;  %v1247_v1 = vrot.slane %v1219_v53, %v2213_v46 }
 0x202   : > { %v1396_v2 = vadd.f32 %v2218_v55, %v2199_v28  ;;  %v1581_v3 = vpack.c.b16 %v1580_v60, %v1580_v60  ;;  %v1254_v4 = vrot.slane %v1226_v57, %v2213_v46  ;;  %v1397_v61 = vadd.f32 %v1393_v62, %v2204_v32 }
 0x203   : > { %v1261_v5 = vrot.slane %v1233_v58, %v2213_v46  ;;  %v1262_v6 = vunpack.c.l.b16 %v1240_v0  ;;  %v1263_v7 = vunpack.c.l.b16 %v1247_v1  ;;  %v1398_v8 = vadd.f32 %v1394_v54, %v2207_v33 }
 0x204   : > { %v1399_v9 = vadd.f32 %v1395_v59, %v2210_v34  ;;  %v1588_v11 = vrot.slane %v1581_v3, %v2213_v46  ;;  %v1264_v12 = vunpack.c.l.b16 %v1254_v4  ;;  %v1400_v14 = vmax.f32 %v1396_v2, 0.0 }
 0x205   : > { %v1265_v13 = vunpack.c.l.b16 %v1261_v5  ;;  %v1266_v55 = vrot.slane %v1263_v7, 7  ;;  %v1401_v15 = vmax.f32 %v1397_v61, 0.0  ;;  %v1402_v16 = vmax.f32 %v1398_v8, 0.0 }
 0x206   : > { %v1403_v19 = vmax.f32 %v1399_v9, 0.0  ;;  %1589 = vrot.lane.b32.xlu0 %v1588_v11, %s2014_s23  ;;  %v1268_v21 = vrot.slane %v1264_v12, 6  ;;  %v1404_v23 = vpack.c.bf16 %v1400_v14, %v1400_v14  ;;  %v763_v24 = vmul.f32 %v2195_v25, %v748_v10  ;;  %s1776_s23 = sshll.u32 %s2084_s9, 7  ;;  %s1656_s9 = scalar_lea.sflag [#allocation6], %s2160_s14 }
 0x207   : > { %v1270_v22 = vrot.slane %v1265_v13, 5  ;;  %v1267_v27 = vsel %vm854_vm3, %v1266_v55, %v1262_v6  ;;  %v1405_v29 = vpack.c.bf16 %v1401_v15, %v1401_v15  ;;  %v1406_v30 = vpack.c.bf16 %v1402_v16, %v1402_v16  ;;  %v1596_v15 = vld [vmem:[%s2453_s5] sm:$0xff]  ;;  %s2405_s12 = scalar_lea.hbm %s2456_s8, %s1776_s23 }
 0x208   : > { %v1407_v35 = vpack.c.bf16 %v1403_v19, %v1403_v19  ;;  %v1269_v36 = vsel %vm857_vm4, %v1268_v21, %v1267_v27  ;;  %v1418_v37 = vrot.slane %v1404_v23, %v2213_v46  ;;  %v764_v38 = vmul.f32 %v2197_v26, %v749_v17 }
 0x209   : > { %v777_v39 = vadd.f32 %v2199_v28, %v2227_v63  ;;  %v1271_v20 = vsel %vm860_vm5, %v1270_v22, %v1269_v36  ;;  %v1425_v40 = vrot.slane %v1405_v29, %v2213_v46  ;;  %v1432_v25 = vrot.slane %v1406_v30, %v2213_v46 }
 0x20a   : > { %v1439_v18 = vrot.slane %v1407_v35, %v2213_v46  ;;  %v1272_v41 = vpack.c.b16 %v1271_v20, %v1271_v20  ;;  %v1446_v42 = vrot.slane %v1418_v37, %v2213_v46  ;;  %v778_v43 = vadd.f32 %v2204_v32, %v763_v24 }
 0x20b   : > { %v779_v44 = vadd.f32 %v2207_v33, %v764_v38  ;;  %v1453_v26 = vrot.slane %v1425_v40, %v2213_v46  ;;  %v1460_v45 = vrot.slane %v1432_v25, %v2213_v46  ;;  %v781_v63 = vmax.f32 %v777_v39, 0.0  ;;  %v1595_v40 = vld [vmem:[%s2452_s4] sm:$0xf] }
 0x20c   : > { %v1467_v28 = vrot.slane %v1439_v18, %v2213_v46  ;;  %v1279_v49 = vrot.slane %v1272_v41, %v2213_v46  ;;  %v782_v47 = vmax.f32 %v778_v43, 0.0  ;;  %v765_v54 = vmul.f32 %v2201_v31, %v750_v48  ;;  %v1650_v25 = vld [vmem:[%s340_s21] sm:$0xf] }
 0x20d   : > { %v783_v50 = vmax.f32 %v779_v44, 0.0  ;;  %v1469_v62 = vunpack.c.l.b16 %v1453_v26  ;;  %v1470_v51 = vunpack.c.l.b16 %v1460_v45  ;;  %v785_v53 = vpack.c.bf16 %v781_v63, %v781_v63 }
 0x20e   : > { %v1471_v52 = vunpack.c.l.b16 %v1467_v28  ;;  %1280 = vrot.lane.b32.xlu1 %v1279_v49, %s2015_s10  ;;  %v786_v32 = vpack.c.bf16 %v782_v47, %v782_v47  ;;  %v1468_v56 = vunpack.c.l.b16 %v1446_v42  ;;  %v780_v1 = vadd.f32 %v2210_v34, %v765_v54  ;;  %s336_s10 = scalar_lea.vmem [#allocation7], %s1759_s15 }
 0x20f   : > { %v787_v33 = vpack.c.bf16 %v783_v50, %v783_v50  ;;  %v1472_v57 = vrot.slane %v1469_v62, 7  ;;  %v1474_v58 = vrot.slane %v1470_v51, 6  ;;  %v799_v3 = vrot.slane %v785_v53, %v2213_v46 }
 0x210   : > { %v1476_v59 = vrot.slane %v1471_v52, 5  ;;  %v806_v60 = vrot.slane %v786_v32, %v2213_v46  ;;  %v784_v61 = vmax.f32 %v780_v1, 0.0  ;;  %v1651_v41 = vunpack.c.l.bf16 %v1650_v25 }
 0x211   : > { %v813_v0 = vrot.slane %v787_v33, %v2213_v46  ;;  %v1473_v2 = vsel %vm854_vm3, %v1472_v57, %v1468_v56  ;;  %v827_v34 = vrot.slane %v799_v3, %v2213_v46 }
 0x212   : > { %v1475_v4 = vsel %vm857_vm4, %v1474_v58, %v1473_v2  ;;  %v834_v5 = vrot.slane %v806_v60, %v2213_v46  ;;  %v788_v9 = vpack.c.bf16 %v784_v61, %v784_v61 }
 0x213   : > { %v841_v31 = vrot.slane %v813_v0, %v2213_v46  ;;  %v1477_v6 = vsel %vm860_vm5, %v1476_v59, %v1475_v4  ;;  %v849_v16 = vunpack.c.l.b16 %v827_v34 }
 0x214   : > { %v1478_v7 = vpack.c.b16 %v1477_v6, %v1477_v6  ;;  %v850_v8 = vunpack.c.l.b16 %v834_v5  ;;  %v820_v12 = vrot.slane %v788_v9, %v2213_v46 }
 0x215   : > { %v851_v10 = vunpack.c.l.b16 %v841_v31 }
 0x216   : > { %v1485_v11 = vrot.slane %v1478_v7, %v2213_v46  ;;  %v853_v13 = vrot.slane %v850_v8, 7  ;;  %v848_v14 = vrot.slane %v820_v12, %v2213_v46 }
 0x217   : > { %v856_v55 = vrot.slane %v851_v10, 6 }
 0x218   : > { %1486 = vrot.lane.b32.xlu1 %v1485_v11, %s2016_s24  ;;  %v852_v19 = vunpack.c.l.b16 %v848_v14  ;;  %v855_v17 = vsel %vm854_vm3, %v853_v13, %v849_v16  ;;  %s1669_s24 = sshll.u32 %s336_s10, 4  ;;  %s2407_s24 = int_to_ptr.vmem [resolvable:$true] %s1669_s24 }
 0x219   : > { %v858_v22 = vsel %vm857_vm4, %v856_v55, %v855_v17  ;;  %s1937_s19 = scalar_lea.vmem %s2407_s24, 128  ;;  %p1944_p7 = scmp.lt.s32.totalorder %s2407_s24, %s1942_s20 }
 0x21a   : > { %v859_v21 = vrot.slane %v852_v19, 5  ;;  %p1938_p12 = scmp.ne.s32.totalorder %s2407_s24, %s1937_s19  ;;  %p1945_p8 = scmp.lt.s32.totalorder %s1943_s13, %s1937_s19 }
 0x21c   : > { %1599 = vperm.xlu1 %1903, %v1596_v15   ;;  %v861_v23 = vsel %vm860_vm5, %v859_v21, %v858_v22  ;;  %p1939_p4 = pnand %p1938_p12, %p2466_p13  ;;  %p1946_p10 = por %p1945_p8, %p1944_p7 }
 0x21d   : > { %v862_v24 = vpack.c.b16 %v861_v23, %v861_v23 }
 0x21e   : > { %p1940_p5 = pneg %p1939_p4 }
 0x21f   : > { %v869_v27 = vrot.slane %v862_v24, %v2213_v46 }
 0x220   : > { %p1947_p0 = pnand %p1946_p10, %p1940_p5 }
 0x221   : > { %872 = vst.msk [vmem:[#allocation3] sm:$0x3] %vm871_vm6, %v869_v27 }
 0x261   : > { %v1178_v35 = vpop.permute.xlu0 %1177 }
 0x262   : > { %v972_v29 = vpop.permute.xlu1 %971 }
 0x263   : > { %975 = vst.msk [vmem:[#allocation3] sm:$0x3] %vm974_vm7, %v972_v29 }
 0x265   : > { %v1384_v37 = vpop.permute.xlu0 %1383 }
 0x270   : > { %v1075_v30 = vpop.permute.xlu1 %1074 }
 0x271   : > { %1078 = vst.msk [vmem:[#allocation3] sm:$0x3] %vm1077_vm8, %v1075_v30 }
 0x272   : > { %1181 = vst.msk [vmem:[#allocation3] sm:$0x3] %vm1180_vm9, %v1178_v35 }
 0x278   : > { %v1590_v38 = vpop.permute.xlu0 %1589 }
 0x280   : > { %v1281_v36 = vpop.permute.xlu1 %1280 }
 0x281   : > { %1284 = vst.msk [vmem:[#allocation3] sm:$0x3] %vm1283_vm10, %v1281_v36 }
 0x282   : > { %1387 = vst.msk [vmem:[#allocation3] sm:$0x3] %vm1386_vm11, %v1384_v37 }
 0x28a   : > { %v1487_v46 = vpop.permute.xlu1 %1486 }
 0x28b   : > { %1490 = vst.msk [vmem:[#allocation3] sm:$0x3] %vm1489_vm12, %v1487_v46 }
 0x28c   : > { %1593 = vst.msk [vmem:[#allocation3] sm:$0x3] %vm1592_vm13, %v1590_v38 }
 0x293   : > { %v1594_v39 = vld [vmem:[#allocation3] sm:$0x3] }
 0x294   : > { %v1608_v20 = vsel %vm1606_vm14, %v1594_v39, 0 }
 0x295   : > { %1838 = vmatpush3.bf16.msra.mxu0 %v1608_v20 }
 0x297   : > { %v1600_v18 = vpop.permute.xlu1 %1599 }
 0x298   : > { %1840 = vmatmul.mubr.msk.bf16.vlgmr.msra.gmra.mxu0 %vm1602_vm15, %v1595_v40 }
 0x358   : > { %v1644_v42 = vpop.f32.mrf.mxu0 }
 0x359   : > { %v1645_v43 = vadd.f32 %v1644_v42, %v1600_v18 }
 0x35a   : > { %v1841_v44 = vpop.f32.mrf.mxu0 }
 0x35b   : > { %v1652_v26 = vadd.f32 %v1651_v41, %v1645_v43 }
 0x35c   : > { %v1647_v45 = vpop.f32.mrf.mxu0 }
 0x35d   : > { %1654 = vst.msk [vmem:[%s336_s10] sm:$0xff] %vm1653_vm0, %v1652_v26 }
 0x35e   : > { %v1842_v28 = vpop.f32.mrf.mxu0 }
 0x35f   : > { %1950 = shalt.err (!%p1947_p0)
}
 0x360   : > { %s1951_s22 = scalar_lea.hbm %s2405_s12, 128  ;;  %s1955_s15 = scalar_lea.hbm %s2456_s8, 256 }
 0x361   : > { %p1952_p2 = scmp.ne.s32.totalorder %s2405_s12, %s1951_s22  ;;  %p1956_p3 = scmp.lt.s32.totalorder %s2405_s12, %s2456_s8 }
 0x362   : > { %p1957_p6 = scmp.lt.s32.totalorder %s1955_s15, %s1951_s22 }
 0x363   : > { %p1953_p9 = pnand %p1952_p2, %p2466_p13 }
 0x364   : > { %p1958_p11 = por %p1957_p6, %p1956_p3 }
 0x365   : > { %p1954_p1 = pneg %p1953_p9 }
 0x367   : > { %p1959_p12 = pnand %p1958_p11, %p1954_p1 }
 0x369   : > { %1962 = shalt.err (!%p1959_p12)
}
 0x36a   : > { %1845 = dma.vmem_to_hbm [thread:$0]  (%p2466_p13), %s2407_s24, 128, %s2405_s12, %s1656_s9  }
 0x36b PF: > { %s1681_s16 = sand.u32 1, %s1989_s27   ;;  %p2467_p4 = scmp.ne.s32.totalorder %s2463_s18, 0 }
 0x36c   : > { %p2468_p5 = scmp.ge.s32.totalorder %s2001_s30, 2  ;;  %s1682_s26 = scalar_lea.sflag [#allocation6], %s1681_s16 }
 0x36e   : > { %p1852_p7 = pnand %p2468_p5, %p2467_p4 }
 0x370   : > { %p1853_p8 = pneg %p1852_p7 }
 0x372   : > { %1984 = dma.done.wait (%p1853_p8), %s1682_s26, 128  }
 0x373   : > { %1986 = vsyncadd (%p1853_p8), %s1682_s26, 4294967168  ;;  %s2469_s19 = sld [smem:[#allocation10_spill]]  ;;  %p21_p10 = scmp.ge.s32.totalorder %s2088_s11, 4  }
 0x374   : > { %s2470_s27 = smov %s1993_s28  ;;  %s2471_s28 = smov %s1997_s29 }
 0x375   : > { %s2473_s30 = smov %s2088_s11  ;;  %23 = sbr.rel (!%p21_p10) target bundleno = 5 (0x5), region = 100 }
 0x379   : > { %s2472_s29 = smov %s2469_s19 }
 0x37a   :  { %1687 = vsyncpa [#allocation5], 1 }
 0x37b   :  { %1689 = vsyncpa [#allocation5 + $0x1], 1 }
 0x37c   :  { %1690 = vsyncpa [#allocation6], 1 }
 0x37d   :  { %1692 = vsyncpa [#allocation6 + $0x1], 1 }

</bundles_post_ra>
